<compile_context>
chip_gen: v7x
topology: tpu7x:2x2x1
jax: 0.10.0
libtpu: 0.0.40
codegen_flags: <defaults>
</compile_context>

<pallas_src>
import functools

import jax
import jax.numpy as jnp
from jax import lax
from jax.experimental import pallas as pl
from jax.experimental.pallas import tpu as pltpu


# -----------------------------------------------------------------------------
# Kernel: fused 3x3 conv (stride 1, pad 1) + folded-BN bias + ReLU.
# Processes `bt` images per grid step with ONE K = 9*cin_pad MXU dot per image.
# -----------------------------------------------------------------------------
def _conv_bn_relu_kernel(x_ref, w_ref, bias_ref, mask_ref, o_ref, xpad_ref,
                         *, width, lpad, cin, bt):
    # x_ref:    (bt, Cin, H*W)          bf16 image(s), spatial on the lane dim
    # w_ref:    (Cout, 9*cin_pad)       bf16, BN scale folded, zero-padded cols
    # bias_ref: (Cout, 1)               f32 folded conv-bias + BN shift
    # mask_ref: (2, H*W)                f32 [0]: kill w==0 wrap, [1]: w==W-1
    # o_ref:    (bt, Cout, H*W)         f32 output
    # xpad_ref: (cin_pad, lpad+H*W+lpad) f32 scratch with zero halos
    cin_pad = xpad_ref.shape[0]
    hw = o_ref.shape[2]

    # One zero fill per grid step (4 vregs at these shapes): provides the
    # vertical zero halo strips AND the zero channel-padding rows.  The centre
    # rows [0, cin) are fully overwritten per image below.
    xpad_ref[...] = jnp.zeros_like(xpad_ref)

    mask_l = mask_ref[pl.ds(0, 1), :]      # (1, H*W), for dw == -1
    mask_r = mask_ref[pl.ds(1, 1), :]      # (1, H*W), for dw == +1
    w2d = w_ref[...]                       # (Cout, 9*cin_pad) bf16

    for i in range(bt):                    # static unroll over the batch tile
        # Write this image's channels into the scratch centre (f32, aligned:
        # lane offset lpad is a multiple of 128, sublane offset 0).
        xpad_ref[pl.ds(0, cin), pl.ds(lpad, hw)] = x_ref[i].astype(jnp.float32)

        # Build the nine shifted taps and stack them on the contraction dim.
        # Wrap-around columns are masked while building the stack.
        slabs = []
        for dh in (-1, 0, 1):
            for dw in (-1, 0, 1):
                start = lpad + dh * width + dw          # static lane offset
                slab = xpad_ref[:, pl.ds(start, hw)]    # (cin_pad, H*W) f32
                if dw == -1:
                    slab = slab * mask_l
                elif dw == 1:
                    slab = slab * mask_r
                slabs.append(slab)
        stacked = jnp.concatenate(slabs, axis=0)        # (9*cin_pad, H*W)

        # ONE MXU dot, bf16 operands, f32 accumulation.
        acc = jnp.dot(w2d, stacked.astype(jnp.bfloat16),
                      preferred_element_type=jnp.float32)   # (Cout, H*W) f32

        y = acc + bias_ref[...]                         # (Cout,H*W) + (Cout,1)
        o_ref[i] = jnp.maximum(y, 0.0).astype(o_ref.dtype)


# -----------------------------------------------------------------------------
# Wrapper: NCHW in, NCHW out.  Only trailing-dim reshapes + one bf16 cast.
# -----------------------------------------------------------------------------
def conv_block_forward(x_nchw, w2d, bias, *, batch_tile=None):
    """x_nchw: (B, Cin, H, W); w2d: (Cout, 9*cin_pad) bf16; bias: (Cout,)."""
    B, Cin, H, W = x_nchw.shape
    Cout = w2d.shape[0]
    HW = H * W
    cin_pad = ((Cin + 7) // 8) * 8            # pad contraction rows to a tile
    assert w2d.shape == (Cout, 9 * cin_pad)
    assert HW % 128 == 0, "flattened spatial dim must be lane-aligned"
    lpad = ((W + 1 + 127) // 128) * 128       # minimal 128-aligned halo >= W+1

    if batch_tile is None:
        # Two fat grid steps: feeds both v7x TensorCores, and on 1-TC
        # v5e/v6e pays the fixed per-step overhead only twice.
        batch_tile = max(1, B // 2)
    bt = batch_tile
    assert B % bt == 0

    x_flat = x_nchw.reshape(B, Cin, HW)       # free collapse of (H, W)
    if x_flat.dtype != jnp.bfloat16:
        # bf16 HBM operand halves the input DMA.  At scale, keep x in bf16
        # end-to-end to avoid this cast copy entirely.
        x_flat = x_flat.astype(jnp.bfloat16)
    bias2 = bias.reshape(Cout, 1).astype(jnp.float32)
    col = jnp.arange(HW, dtype=jnp.int32) % W
    masks = jnp.stack([(col != 0), (col != W - 1)]).astype(jnp.float32)

    kernel = functools.partial(_conv_bn_relu_kernel,
                               width=W, lpad=lpad, cin=Cin, bt=bt)
    out_flat = pl.pallas_call(
        kernel,
        out_shape=jax.ShapeDtypeStruct((B, Cout, HW), jnp.float32),
        grid_spec=pltpu.PrefetchScalarGridSpec(
            num_scalar_prefetch=0,
            grid=(B // bt,),
            in_specs=[
                pl.BlockSpec((bt, Cin, HW), lambda b: (b, 0, 0)),
                pl.BlockSpec((Cout, 9 * cin_pad), lambda b: (0, 0)),
                pl.BlockSpec((Cout, 1), lambda b: (0, 0)),
                pl.BlockSpec((2, HW), lambda b: (0, 0)),
            ],
            out_specs=pl.BlockSpec((bt, Cout, HW), lambda b: (b, 0, 0)),
            scratch_shapes=[
                pltpu.VMEM((cin_pad, lpad + HW + lpad), jnp.float32)],
        ),
        compiler_params=pltpu.CompilerParams(
            dimension_semantics=("parallel",)),
    )(x_flat, w2d, bias2, masks)
    return out_flat.reshape(B, Cout, H, W)


# -----------------------------------------------------------------------------
# Parameters: deterministic init, BN (inference form) folded into weight/bias.
# Weights stored contiguously as (Cout, 9*cin_pad) bf16, column index
#   = (kh*3 + kw)*cin_pad + cin  (padded cin columns are zero).
# -----------------------------------------------------------------------------
def make_conv_block_params(key, cin, cout, eps=1e-5):
    kw_, kb_, kg_, kbt_ = jax.random.split(key, 4)
    fan_in, fan_out = cin * 9, cout * 9
    std = jnp.sqrt(2.0 / (fan_in + fan_out))
    w = jax.random.normal(kw_, (cout, cin, 3, 3), jnp.float32) * std   # OIHW
    conv_b = 0.01 * jax.random.normal(kb_, (cout,), jnp.float32)
    gamma = 1.0 + 0.1 * jax.random.normal(kg_, (cout,), jnp.float32)
    beta = 0.1 * jax.random.normal(kbt_, (cout,), jnp.float32)
    r_mean = jnp.zeros((cout,), jnp.float32)
    r_var = jnp.ones((cout,), jnp.float32)

    scale = gamma / jnp.sqrt(r_var + eps)                       # (Cout,)
    w_eff = w * scale[:, None, None, None]                      # fold BN scale
    bias_eff = (conv_b - r_mean) * scale + beta                 # fold BN shift

    cin_pad = ((cin + 7) // 8) * 8
    w_t = jnp.transpose(w_eff, (0, 2, 3, 1))                    # (Cout,3,3,Cin)
    w_t = jnp.pad(w_t, ((0, 0), (0, 0), (0, 0), (0, cin_pad - cin)))
    w2d = w_t.reshape(cout, 9 * cin_pad).astype(jnp.bfloat16)   # one flat tile

    raw = dict(w=w, b=conv_b, gamma=gamma, beta=beta,
               mean=r_mean, var=r_var, eps=eps)
    return w2d, bias_eff, raw


def conv_block_reference(x, raw):
    """Unfused PyTorch-style reference: conv -> BN(inference) -> ReLU (f32)."""
    y = lax.conv_general_dilated(
        x, raw["w"], window_strides=(1, 1), padding=((1, 1), (1, 1)),
        dimension_numbers=("NCHW", "OIHW", "NCHW"))
    y = y + raw["b"][None, :, None, None]
    y = (y - raw["mean"][None, :, None, None]) / jnp.sqrt(
        raw["var"][None, :, None, None] + raw["eps"])
    y = y * raw["gamma"][None, :, None, None] + raw["beta"][None, :, None, None]
    return jnp.maximum(y, 0.0)


if __name__ == "__main__":
    B, Cin, Cout, H, W = 2, 4, 8, 16, 16
    kx, kp = jax.random.split(jax.random.PRNGKey(0))

    x = jax.random.normal(kx, (B, Cin, H, W), jnp.float32)     # NCHW input
    w2d, bias_eff, raw = make_conv_block_params(kp, Cin, Cout)

    fwd = jax.jit(conv_block_forward)
    out = fwd(x, w2d, bias_eff)
    jax.block_until_ready(out)
    assert out.shape == (B, Cout, H, W)

    ref = conv_block_reference(x, raw)
    # Tolerance sized for bf16 matmul operands (f32 accumulation); an all-f32
    # path would be ~1e-6.
    assert jnp.allclose(out, ref, atol=3e-2, rtol=3e-2), float(
        jnp.max(jnp.abs(out - ref)))
    print("KERNEL_OK")
</pallas_src>

<mosaic_0001>
module attributes {stable_mosaic.version = 11 : i64} {
  func.func @_conv_bn_relu_kernel(%arg0: i32, %arg1: memref<1x4x256xbf16, #tpu.memory_space<vmem>>, %arg2: memref<8x72xbf16, #tpu.memory_space<vmem>>, %arg3: memref<8x1xf32, #tpu.memory_space<vmem>>, %arg4: memref<2x256xf32, #tpu.memory_space<vmem>>, %arg5: memref<1x8x256xf32, #tpu.memory_space<vmem>>, %arg6: memref<8x512xf32, #tpu.memory_space<vmem>>) attributes {dimension_semantics = [#tpu.dimension_semantics<parallel>], iteration_bounds = array<i64: 2>, scalar_prefetch = 0 : i64, scratch_operands = 1 : i64, tpu.core_type = #tpu.core_type<tc>, window_params = [{transform_indices = @transform_0, window_bounds = array<i64: 1, 4, 256>}, {pipeline_mode = #tpu.pipeline_mode<synchronous>, transform_indices = @transform_1, window_bounds = array<i64: 8, 72>}, {pipeline_mode = #tpu.pipeline_mode<synchronous>, transform_indices = @transform_2, window_bounds = array<i64: 8, 1>}, {pipeline_mode = #tpu.pipeline_mode<synchronous>, transform_indices = @transform_3, window_bounds = array<i64: 2, 256>}, {transform_indices = @transform_4, window_bounds = array<i64: 1, 8, 256>}]} {
    %cst = arith.constant 0.000000e+00 : f32
    %0 = vector.broadcast %cst : f32 to vector<8x512xf32>
    %c0 = arith.constant 0 : index
    %c0_0 = arith.constant 0 : index
    %1 = vector.load %arg6[%c0, %c0_0] : memref<8x512xf32, #tpu.memory_space<vmem>>, vector<8x512xf32>
    tpu.vector_store %arg6[%c0, %c0_0], %0 {strides = array<i32>} : memref<8x512xf32, #tpu.memory_space<vmem>>, vector<8x512xf32>,
    %c0_1 = arith.constant 0 : index
    %c0_2 = arith.constant 0 : index
    %2 = vector.load %arg4[%c0_1, %c0_2] : memref<2x256xf32, #tpu.memory_space<vmem>>, vector<1x256xf32>
    %c1 = arith.constant 1 : index
    %c0_3 = arith.constant 0 : index
    %3 = vector.load %arg4[%c1, %c0_3] : memref<2x256xf32, #tpu.memory_space<vmem>>, vector<1x256xf32>
    %c0_4 = arith.constant 0 : index
    %c0_5 = arith.constant 0 : index
    %4 = vector.load %arg2[%c0_4, %c0_5] : memref<8x72xbf16, #tpu.memory_space<vmem>>, vector<8x72xbf16>
    %c0_6 = arith.constant 0 : index
    %c0_7 = arith.constant 0 : index
    %c0_8 = arith.constant 0 : index
    %5 = vector.load %arg1[%c0_6, %c0_7, %c0_8] : memref<1x4x256xbf16, #tpu.memory_space<vmem>>, vector<1x4x256xbf16>
    %6 = vector.shape_cast %5 : vector<1x4x256xbf16> to vector<4x256xbf16>
    %7 = arith.extf %6 : vector<4x256xbf16> to vector<4x256xf32>
    %c0_9 = arith.constant 0 : index
    %c128 = arith.constant 128 : index
    %8 = vector.load %arg6[%c0_9, %c128] : memref<8x512xf32, #tpu.memory_space<vmem>>, vector<4x256xf32>
    tpu.vector_store %arg6[%c0_9, %c128], %7 {strides = array<i32>} : memref<8x512xf32, #tpu.memory_space<vmem>>, vector<4x256xf32>,
    %c0_10 = arith.constant 0 : index
    %c111 = arith.constant 111 : index
    %9 = vector.load %arg6[%c0_10, %c111] : memref<8x512xf32, #tpu.memory_space<vmem>>, vector<8x256xf32>
    %10 = vector.broadcast %2 : vector<1x256xf32> to vector<8x256xf32>
    %11 = arith.mulf %9, %10 : vector<8x256xf32>
    %c0_11 = arith.constant 0 : index
    %c112 = arith.constant 112 : index
    %12 = vector.load %arg6[%c0_11, %c112] : memref<8x512xf32, #tpu.memory_space<vmem>>, vector<8x256xf32>
    %c0_12 = arith.constant 0 : index
    %c113 = arith.constant 113 : index
    %13 = vector.load %arg6[%c0_12, %c113] : memref<8x512xf32, #tpu.memory_space<vmem>>, vector<8x256xf32>
    %14 = vector.broadcast %3 : vector<1x256xf32> to vector<8x256xf32>
    %15 = arith.mulf %13, %14 : vector<8x256xf32>
    %c0_13 = arith.constant 0 : index
    %c127 = arith.constant 127 : index
    %16 = vector.load %arg6[%c0_13, %c127] : memref<8x512xf32, #tpu.memory_space<vmem>>, vector<8x256xf32>
    %17 = vector.broadcast %2 : vector<1x256xf32> to vector<8x256xf32>
    %18 = arith.mulf %16, %17 : vector<8x256xf32>
    %c0_14 = arith.constant 0 : index
    %c128_15 = arith.constant 128 : index
    %19 = vector.load %arg6[%c0_14, %c128_15] : memref<8x512xf32, #tpu.memory_space<vmem>>, vector<8x256xf32>
    %c0_16 = arith.constant 0 : index
    %c129 = arith.constant 129 : index
    %20 = vector.load %arg6[%c0_16, %c129] : memref<8x512xf32, #tpu.memory_space<vmem>>, vector<8x256xf32>
    %21 = vector.broadcast %3 : vector<1x256xf32> to vector<8x256xf32>
    %22 = arith.mulf %20, %21 : vector<8x256xf32>
    %c0_17 = arith.constant 0 : index
    %c143 = arith.constant 143 : index
    %23 = vector.load %arg6[%c0_17, %c143] : memref<8x512xf32, #tpu.memory_space<vmem>>, vector<8x256xf32>
    %24 = vector.broadcast %2 : vector<1x256xf32> to vector<8x256xf32>
    %25 = arith.mulf %23, %24 : vector<8x256xf32>
    %c0_18 = arith.constant 0 : index
    %c144 = arith.constant 144 : index
    %26 = vector.load %arg6[%c0_18, %c144] : memref<8x512xf32, #tpu.memory_space<vmem>>, vector<8x256xf32>
    %c0_19 = arith.constant 0 : index
    %c145 = arith.constant 145 : index
    %27 = vector.load %arg6[%c0_19, %c145] : memref<8x512xf32, #tpu.memory_space<vmem>>, vector<8x256xf32>
    %28 = vector.broadcast %3 : vector<1x256xf32> to vector<8x256xf32>
    %29 = arith.mulf %27, %28 : vector<8x256xf32>
    %30 = tpu.concatenate %11, %12, %15, %18, %19, %22, %25, %26, %29 in 0 : vector<8x256xf32>, vector<8x256xf32>, vector<8x256xf32>, vector<8x256xf32>, vector<8x256xf32>, vector<8x256xf32>, vector<8x256xf32>, vector<8x256xf32>, vector<8x256xf32> -> vector<72x256xf32>
    %31 = arith.truncf %30 : vector<72x256xf32> to vector<72x256xbf16>
    %cst_20 = arith.constant dense<0.000000e+00> : vector<8x256xf32>
    %32 = tpu.matmul %4, %31, %cst_20 {dimension_numbers = #tpu.dot_dimension_numbers<[1], [0], [0], [1], [0, 0, 1, 1], [], []>} : vector<8x72xbf16>, vector<72x256xbf16>, vector<8x256xf32> -> vector<8x256xf32>
    %c0_21 = arith.constant 0 : index
    %c0_22 = arith.constant 0 : index
    %33 = vector.load %arg3[%c0_21, %c0_22] : memref<8x1xf32, #tpu.memory_space<vmem>>, vector<8x1xf32>
    %34 = vector.broadcast %33 : vector<8x1xf32> to vector<8x256xf32>
    %35 = arith.addf %32, %34 : vector<8x256xf32>
    %cst_23 = arith.constant 0.000000e+00 : f32
    %36 = vector.broadcast %cst_23 : f32 to vector<8x256xf32>
    %37 = arith.maximumf %35, %36 : vector<8x256xf32>
    %c0_24 = arith.constant 0 : index
    %c0_25 = arith.constant 0 : index
    %c0_26 = arith.constant 0 : index
    %38 = vector.load %arg5[%c0_24, %c0_25, %c0_26] : memref<1x8x256xf32, #tpu.memory_space<vmem>>, vector<1x8x256xf32>
    %39 = vector.shape_cast %38 : vector<1x8x256xf32> to vector<8x256xf32>
    %40 = vector.shape_cast %37 : vector<8x256xf32> to vector<1x8x256xf32>
    tpu.vector_store %arg5[%c0_24, %c0_25, %c0_26], %40 {strides = array<i32>} : memref<1x8x256xf32, #tpu.memory_space<vmem>>, vector<1x8x256xf32>,
    return
  }
  func.func @transform_0(%arg0: i32) -> (i32, i32, i32) {
    %c0_i32 = arith.constant 0 : i32
    %c0_i32_0 = arith.constant 0 : i32
    %c0_i32_1 = arith.constant 0 : i32
    return %arg0, %c0_i32, %c0_i32_0 : i32, i32, i32
  }
  func.func @transform_1(%arg0: i32) -> (i32, i32) {
    %c0_i32 = arith.constant 0 : i32
    %c0_i32_0 = arith.constant 0 : i32
    %c0_i32_1 = arith.constant 0 : i32
    return %c0_i32, %c0_i32_0 : i32, i32
  }
  func.func @transform_2(%arg0: i32) -> (i32, i32) {
    %c0_i32 = arith.constant 0 : i32
    %c0_i32_0 = arith.constant 0 : i32
    %c0_i32_1 = arith.constant 0 : i32
    return %c0_i32, %c0_i32_0 : i32, i32
  }
  func.func @transform_3(%arg0: i32) -> (i32, i32) {
    %c0_i32 = arith.constant 0 : i32
    %c0_i32_0 = arith.constant 0 : i32
    %c0_i32_1 = arith.constant 0 : i32
    return %c0_i32, %c0_i32_0 : i32, i32
  }
  func.func @transform_4(%arg0: i32) -> (i32, i32, i32) {
    %c0_i32 = arith.constant 0 : i32
    %c0_i32_0 = arith.constant 0 : i32
    %c0_i32_1 = arith.constant 0 : i32
    return %arg0, %c0_i32, %c0_i32_0 : i32, i32, i32
  }
}

</mosaic_0001>

<bundles_post_ra>
// kernel: conv_block_forward.1
= control target key start
LH: loop header
LB: loop body
LE: loop exit
PB: predicated region body
PF: predicated region fallthrough
CT: control target
= control target key end

     0   :  { %s744_s15 = smov 0   ;;  %s852_s0 = inlined_call_operand.vmem [shape: bf16[2,4,256], index: 0, kind: input, shape index: {}]   ;;  %s853_s1 = inlined_call_operand.vmem [shape: bf16[8,72], index: 1, kind: input, shape index: {}]   ;;  %s854_s2 = inlined_call_operand.vmem [shape: f32[8,1], index: 2, kind: input, shape index: {}]   ;;  %s855_s3 = inlined_call_operand.vmem [shape: f32[2,256], index: 3, kind: input, shape index: {}]   ;;  %s856_s4 = inlined_call_operand.vmem [shape: f32[2,8,256], index: 4, kind: output, shape index: {}]  }
   0x1 LB: > { %s618_s16 = sadd.s32 4294967295, %s703_s15   ;;  %p622_p0 = scmp.ge.s32.totalorder %s703_s15, 1  ;;  %s703_s15 = sphi %s744_s15, %s14_s15  }
   0x2   : > { %p162_p1 = scmp.lt.s32.totalorder %s703_s15, 3 }
   0x4   : > { %p163_p2 = pnand %p622_p0, %p162_p1 }
   0x5   : > { %v218_v0 = vlaneseq (!%p163_p2)  ;;  %v705_v1 = vmov (!%p163_p2), 0.0   ;;  %v627_v2 = vld [vmem:[%s855_s3 + $0x1] ss:$2 sm:$0x3] (!%p163_p2)  ;;  %p188_p3 = scmp.lt.s32.totalorder (!%p163_p2), %s618_s16, 1  ;;  %s706_s22 = smov (!%p163_p2), 113  }
   0x6   : > { %166 = sbr.rel (%p163_p2) target bundleno = 623 (0x26f), region = 36  ;;  %200 = vst [vmem:[#allocation2 + $0x8] sm:$0xff] (!%p163_p2), %v705_v1  ;;  %201 = vst [vmem:[#allocation2 + $0x10] sm:$0xff] (!%p163_p2), %v705_v1  ;;  %v203_v4 = vld [vmem:[%s855_s3] ss:$2 sm:$0x3] (!%p163_p2) }
   0x7   : > { %v219_v3 = vshrl.u32 (!%p163_p2), %v218_v0, 7  ;;  %s707_s23 = smov (!%p163_p2), 127   ;;  %s708_s27 = smov (!%p163_p2), 1   ;;  %vm263_vm0 = vcmask (!%p163_p2), 1039360   ;;  %vm251_vm1 = vcmask (!%p163_p2), 924672   ;;  %vm278_vm2 = vcmask (!%p163_p2), 7168  }
   0x8   : > { %s709_s28 = smov (!%p163_p2), 15   ;;  %s710_s29 = smov (!%p163_p2), 17   ;;  %vm290_vm3 = vcmask (!%p163_p2), 121856   ;;  %vm302_vm4 = vcmask (!%p163_p2), 138240   ;;  %vm230_vm5 = vcmask (!%p163_p2), 908288   ;;  %vm333_vm6 = vcmask (!%p163_p2), 1031168  }
   0x9   : > { %v220_v5 = vsub.s32 (!%p163_p2), 0, %v219_v3  ;;  %v224_v6 = vsub.s32 (!%p163_p2), 1, %v219_v3  ;;  %s711_s30 = smov (!%p163_p2), 111   ;;  %s712_s5 = smov (!%p163_p2), 112   ;;  %vm348_vm7 = vcmask (!%p163_p2), 916480   ;;  %vm371_vm8 = vcmask (!%p163_p2), 900096  }
   0xa   : > { %s713_s6 = smov (!%p163_p2), 126   ;;  %s714_s7 = smov (!%p163_p2), 95   ;;  %vm386_vm9 = vcmask (!%p163_p2), 785408   ;;  %vm401_vm10 = vcmask (!%p163_p2), 777216   ;;  %vm416_vm11 = vcmask (!%p163_p2), 769024   ;;  %vm511_vm12 = vcmask (!%p163_p2), 1043456  }
   0xb   : > { %v242_v7 = vrot.slane (!%p163_p2), %v627_v2, %v220_v5  ;;  %v221_v8 = vrot.slane (!%p163_p2), %v203_v4, %v220_v5  ;;  %v246_v9 = vrot.slane (!%p163_p2), %v627_v2, %v224_v6  ;;  %v225_v10 = vrot.slane (!%p163_p2), %v203_v4, %v224_v6  ;;  %s715_s8 = smov (!%p163_p2), 110   ;;  %s716_s9 = smov (!%p163_p2), 96  }
   0xc   : > { %s717_s10 = smov (!%p163_p2), 94   ;;  %vm507_vm13 = vcmask (!%p163_p2), 588800  }
   0xd   : > { %s858_s16 = smov (!%p188_p3, %s618_s16), 1  ;;  %247 = vrot.lane.b32.xlu0 %v242_v7, %s706_s22  ;;  %259 = vrot.lane.b32.xlu1 %v221_v8, %s707_s23 }
   0xe   : > { %s632_s21 = sshll.u32 %s858_s16, 2  ;;  %s633_s17 = sshll.u32 %s858_s16, 4 }
   0xf   : > { %s192_s26 = scalar_lea.vmem %s852_s0, %s632_s21  ;;  %s197_s20 = scalar_lea.vmem %s856_s4, %s633_s17 }
  0x10   : > { %v207_v11 = vld [vmem:[%s192_s26] sm:$0xf] }
  0x11   : > { %v208_v12 = vunpack.c.l.bf16 %v207_v11  ;;  %249 = vrot.lane.b32.xlu0 %v246_v9, %s706_s22  ;;  %261 = vrot.lane.b32.xlu1 %v225_v10, %s707_s23 }
  0x13   : > { %v210_v13 = vcombine.high %v208_v12, %v208_v12  ;;  %212 = vst [vmem:[#allocation2 + $0x8] sm:$0xf] %v208_v12 }
  0x15   : > { %213 = vst [vmem:[#allocation2 + $0x10] sm:$0xf] %v210_v13  ;;  %274 = vrot.lane.b32.xlu0 %v242_v7, %s708_s27  ;;  %276 = vrot.lane.b32.xlu1 %v246_v9, %s708_s27 }
  0x19   : > { %286 = vrot.lane.b32.xlu0 %v221_v8, %s709_s28  ;;  %288 = vrot.lane.b32.xlu1 %v225_v10, %s709_s28 }
  0x1a   : > { %v768_v14 = vld [vmem:[#allocation2 + $0x8] sm:$0xff] }
  0x1c   : > { %v770_v15 = vld [vmem:[#allocation2 + $0x10] sm:$0xff] }
  0x1d   : > { %298 = vrot.lane.b32.xlu0 %v242_v7, %s710_s29  ;;  %300 = vrot.lane.b32.xlu1 %v246_v9, %s710_s29  ;;  %v656_v16 = vpack.i.bf16 %v770_v15, %v768_v14 }
  0x21   : > { %226 = vrot.lane.b32.xlu0 %v221_v8, %s711_s30  ;;  %228 = vrot.lane.b32.xlu1 %v225_v10, %s711_s30 }
  0x25   : > { %657 = vrot.lane.b32.xlu0 %v656_v16, %s707_s23  ;;  %313 = vrot.lane.b32.xlu1 %v705_v1, %s707_s23 }
  0x29   : > { %662 = vrot.lane.b32.xlu0 %v656_v16, %s711_s30 }
  0x7f   : > { %v248_v17 = vpop.permute.xlu0 %247  ;;  %v260_v18 = vpop.permute.xlu1 %259 }
  0x80   : > { %v256_v19 = vmul.f32 0.0, %v248_v17  ;;  %v268_v20 = vmul.f32 0.0, %v260_v18 }
  0x82   : > { %342 = vrot.lane.b32.xlu1 %v268_v20, %s712_s5  ;;  %327 = vrot.lane.b32.xlu0 %v256_v19, %s713_s6 }
  0x83   : > { %v250_v21 = vpop.permute.xlu0 %249  ;;  %v262_v22 = vpop.permute.xlu1 %261 }
  0x84   : > { %v264_v23 = vsel %vm263_vm0, %v260_v18, %v262_v22  ;;  %v270_v24 = vmul.f32 %v262_v22, %v770_v15  ;;  %v252_v25 = vsel %vm251_vm1, %v248_v17, %v250_v21  ;;  %v258_v27 = vmul.f32 %v250_v21, %v770_v15 }
  0x85   : > { %v269_v26 = vmul.f32 %v264_v23, %v768_v14  ;;  %v257_v31 = vmul.f32 %v252_v25, %v768_v14 }
  0x86   : > { %672 = vrot.lane.b32.xlu1 %v656_v16, %s714_s7 }
  0x87   : > { %v676_v28 = vpack.i.bf16 %v270_v24, %v269_v26  ;;  %v275_v29 = vpop.permute.xlu0 %274  ;;  %v277_v30 = vpop.permute.xlu1 %276  ;;  %v666_v39 = vpack.i.bf16 %v258_v27, %v257_v31 }
  0x88   : > { %v283_v32 = vmul.f32 %v275_v29, %v768_v14  ;;  %v279_v33 = vsel %vm278_vm2, %v275_v29, %v277_v30  ;;  %v285_v34 = vmul.f32 0.0, %v277_v30 }
  0x89   : > { %v284_v35 = vmul.f32 %v279_v33, %v770_v15 }
  0x8a   : > { %369 = vrot.lane.b32.xlu0 %v285_v34, %s715_s8  ;;  %677 = vrot.lane.b32.xlu1 %v676_v28, %s712_s5 }
  0x8b   : > { %v287_v36 = vpop.permute.xlu0 %286  ;;  %v289_v37 = vpop.permute.xlu1 %288  ;;  %v681_v38 = vpack.i.bf16 %v284_v35, %v283_v32 }
  0x8c   : > { %v295_v40 = vmul.f32 %v287_v36, %v768_v14  ;;  %v291_v41 = vsel %vm290_vm3, %v287_v36, %v289_v37  ;;  %v297_v46 = vmul.f32 0.0, %v289_v37 }
  0x8d   : > { %v296_v42 = vmul.f32 %v291_v41, %v770_v15 }
  0x8e   : > { %682 = vrot.lane.b32.xlu1 %v681_v38, %s715_s8  ;;  %667 = vrot.lane.b32.xlu0 %v666_v39, %s713_s6 }
  0x8f   : > { %v299_v43 = vpop.permute.xlu0 %298  ;;  %v301_v44 = vpop.permute.xlu1 %300  ;;  %v686_v45 = vpack.i.bf16 %v296_v42, %v295_v40 }
  0x90   : > { %v307_v47 = vmul.f32 %v299_v43, %v768_v14  ;;  %v303_v48 = vsel %vm302_vm4, %v299_v43, %v301_v44  ;;  %v309_v58 = vmul.f32 0.0, %v301_v44 }
  0x91   : > { %v308_v49 = vmul.f32 %v303_v48, %v770_v15 }
  0x92   : > { %687 = vrot.lane.b32.xlu1 %v686_v45, %s716_s9  ;;  %384 = vrot.lane.b32.xlu0 %v297_v46, %s716_s9 }
  0x93   : > { %v691_v50 = vpack.i.bf16 %v308_v49, %v307_v47  ;;  %v227_v51 = vpop.permute.xlu0 %226  ;;  %v229_v52 = vpop.permute.xlu1 %228 }
  0x94   : > { %v231_v53 = vsel %vm230_vm5, %v227_v51, %v229_v52  ;;  %v237_v54 = vmul.f32 %v229_v52, %v770_v15  ;;  %v235_v55 = vmul.f32 0.0, %v227_v51  ;;  %v718_v51 = vmov 0  }
  0x95   : > { %v236_v61 = vmul.f32 %v231_v53, %v768_v14  ;;  %550 = vmatprep.mubr.bf16.mxu0 %v718_v51  ;;  %696 = vset.pattern.permute.xlu0 %v718_v51 }
  0x96   : > { %692 = vrot.lane.b32.xlu1 %v691_v50, %s717_s10  ;;  %399 = vrot.lane.b32.xlu0 %v705_v1, %s714_s7 }
  0x97   : > { %v658_v56 = vpop.permute.xlu0 %657  ;;  %v314_v57 = vpop.permute.xlu1 %313 }
  0x98   : > { %v660_v59 = vunpack.i.h.bf16 %v658_v56  ;;  %v659_v60 = vunpack.i.l.bf16 %v658_v56 }
  0x9a   : > { %414 = vrot.lane.b32.xlu0 %v309_v58, %s717_s10  ;;  %v424_v62 = vpack.c.bf16 %v660_v59, %v237_v54  ;;  %v319_v63 = vsel %vm263_vm0, %v314_v57, %v659_v60  ;;  %v320_v0 = vsel %vm263_vm0, %v659_v60, %v660_v59 }
  0x9b   : > { %v422_v2 = vpack.c.bf16 %v319_v63, %v235_v55  ;;  %v423_v1 = vpack.c.bf16 %v320_v0, %v236_v61  ;;  %v663_v3 = vpop.permute.xlu0 %662  ;;  %v437_v61 = vld [vmem:[%s854_s2] sm:$0xff] }
  0x9c   : > { %v664_v18 = vunpack.i.l.bf16 %v663_v3  ;;  %v665_v29 = vunpack.i.h.bf16 %v663_v3 }
  0x9d   : > { %458 = vrot.lane.b32.xlu1 %v422_v2, %s710_s29 }
  0x9e   : > { %462 = vrot.lane.b32.xlu0 %v424_v62, %s710_s29  ;;  %v358_v38 = vsel %vm230_vm5, %v664_v18, %v665_v29 }
  0xa1   : > { %460 = vrot.lane.b32.xlu1 %v423_v1, %s710_s29 }
  0xf4   : > { %v343_v4 = vpop.permute.xlu1 %342  ;;  %v328_v5 = vpop.permute.xlu0 %327 }
  0xf8   : > { %v800_v6 = vpop.permute.xlu1 %672 }
  0xf9   : > { %v674_v19 = vunpack.i.l.bf16 %v800_v6  ;;  %v675_v36 = vunpack.i.h.bf16 %v800_v6 }
  0xfb   : > { %v402_v56 = vsel %vm401_vm10, %v674_v19, %v675_v36 }
  0xfc   : > { %v370_v7 = vpop.permute.xlu0 %369  ;;  %v678_v8 = vpop.permute.xlu1 %677 }
  0xfd   : > { %v680_v11 = vunpack.i.h.bf16 %v678_v8  ;;  %v679_v21 = vunpack.i.l.bf16 %v678_v8 }
  0xff   : > { %v350_v30 = vsel %vm348_vm7, %v679_v21, %v680_v11  ;;  %v349_v39 = vsel %vm348_vm7, %v343_v4, %v679_v21 }
 0x100   : > { %v683_v9 = vpop.permute.xlu1 %682  ;;  %v668_v10 = vpop.permute.xlu0 %667 }
 0x101   : > { %v670_v12 = vunpack.i.h.bf16 %v668_v10  ;;  %v684_v13 = vunpack.i.l.bf16 %v683_v9  ;;  %v669_v15 = vunpack.i.l.bf16 %v668_v10  ;;  %v685_v24 = vunpack.i.h.bf16 %v683_v9 }
 0x103   : > { %v427_v14 = vpack.c.bf16 %v680_v11, %v670_v12  ;;  %v428_v22 = vpack.c.bf16 %v684_v13, %v664_v18  ;;  %v335_v27 = vsel %vm333_vm6, %v669_v15, %v670_v12  ;;  %v372_v33 = vsel %vm371_vm8, %v684_v13, %v685_v24 }
 0x104   : > { %v688_v16 = vpop.permute.xlu1 %687  ;;  %v385_v17 = vpop.permute.xlu0 %384  ;;  %v426_v32 = vpack.c.bf16 %v350_v30, %v335_v27  ;;  %v334_v34 = vsel %vm333_vm6, %v328_v5, %v669_v15  ;;  %v429_v40 = vpack.c.bf16 %v372_v33, %v358_v38  ;;  %v373_v45 = vsel %vm371_vm8, %v685_v24, %v370_v7 }
 0x105   : > { %v689_v20 = vunpack.i.l.bf16 %v688_v16  ;;  %468 = vrot.lane.b32.xlu1 %v427_v14, %s710_s29  ;;  %v690_v37 = vunpack.i.h.bf16 %v688_v16  ;;  %v425_v41 = vpack.c.bf16 %v349_v39, %v334_v34  ;;  %v430_v49 = vpack.c.bf16 %v373_v45, %v665_v29 }
 0x107   : > { %v431_v23 = vpack.c.bf16 %v674_v19, %v689_v20  ;;  %v388_v47 = vsel %vm386_vm9, %v690_v37, %v385_v17  ;;  %v387_v53 = vsel %vm386_vm9, %v689_v20, %v690_v37  ;;  %v206_v19 = vld [vmem:[%s853_s1] sm:$0xf] }
 0x108   : > { %v693_v25 = vpop.permute.xlu1 %692  ;;  %v400_v26 = vpop.permute.xlu0 %399  ;;  %v432_v58 = vpack.c.bf16 %v402_v56, %v387_v53 }
 0x109   : > { %v694_v28 = vunpack.i.l.bf16 %v693_v25  ;;  %470 = vrot.lane.b32.xlu1 %v428_v22, %s710_s29  ;;  %476 = vrot.lane.b32.xlu0 %v431_v23, %s710_s29  ;;  %v695_v43 = vunpack.i.h.bf16 %v693_v25  ;;  %v403_v44 = vsel %vm401_vm10, %v675_v36, %v400_v26 }
 0x10a   : > { %v433_v48 = vpack.c.bf16 %v403_v44, %v388_v47 }
 0x10b   : > { %v434_v31 = vpack.c.bf16 %v694_v28, %v694_v28  ;;  %v417_v59 = vsel %vm416_vm11, %v694_v28, %v695_v43 }
 0x10c   : > { %v415_v35 = vpop.permute.xlu0 %414  ;;  %v435_v60 = vpack.c.bf16 %v417_v59, %v417_v59 }
 0x10d   : > { %482 = vrot.lane.b32.xlu1 %v434_v31, %s710_s29  ;;  %466 = vrot.lane.b32.xlu0 %v426_v32, %s710_s29  ;;  %v418_v52 = vsel %vm416_vm11, %v695_v43, %v415_v35 }
 0x10e   : > { %v436_v57 = vpack.c.bf16 %v418_v52, %v418_v52 }
 0x10f   : > { %v459_v42 = vpop.permute.xlu1 %458 }
 0x110   : > { %v463_v46 = vpop.permute.xlu0 %462 }
 0x111   : > { %472 = vrot.lane.b32.xlu1 %v429_v40, %s710_s29  ;;  %464 = vrot.lane.b32.xlu0 %v425_v41, %s710_s29 }
 0x113   : > { %v461_v50 = vpop.permute.xlu1 %460 }
 0x114   : > { %v490_v54 = vsel %vm302_vm4, %v461_v50, %v463_v46  ;;  %v489_v55 = vsel %vm302_vm4, %v459_v42, %v461_v50 }
 0x115   : > { %480 = vrot.lane.b32.xlu1 %v433_v48, %s710_s29  ;;  %474 = vrot.lane.b32.xlu0 %v430_v49, %s710_s29 }
 0x116   : > { %518 = vmatprep.subr.bf16.mxu0 %v490_v54 }
 0x117   : > { %519 = vmatpush1.bf16.msra.mxu0 %v489_v55 }
 0x119   : > { %486 = vrot.lane.b32.xlu1 %v436_v57, %s710_s29  ;;  %478 = vrot.lane.b32.xlu0 %v432_v58, %s710_s29 }
 0x11d   : > { %484 = vrot.lane.b32.xlu0 %v435_v60, %s710_s29 }
 0x121   : > { %440 = vperm.xlu0 %696, %v437_v61  }
 0x177   : > { %v469_v62 = vpop.permute.xlu1 %468 }
 0x17b   : > { %v471_v63 = vpop.permute.xlu1 %470  ;;  %v477_v0 = vpop.permute.xlu0 %476 }
 0x17f   : > { %v483_v2 = vpop.permute.xlu1 %482  ;;  %v467_v1 = vpop.permute.xlu0 %466 }
 0x180   : > { %v492_v3 = vsel %vm302_vm4, %v467_v1, %v469_v62 }
 0x181   : > { %520 = vmatprep.subr.bf16.mxu0 %v492_v3 }
 0x183   : > { %v473_v4 = vpop.permute.xlu1 %472  ;;  %v465_v5 = vpop.permute.xlu0 %464 }
 0x184   : > { %v491_v6 = vsel %vm302_vm4, %v465_v5, %v467_v1  ;;  %v493_v10 = vsel %vm302_vm4, %v471_v63, %v473_v4 }
 0x185   : > { %521 = vmatpush1.bf16.msra.mxu0 %v491_v6 }
 0x187   : > { %v475_v7 = vpop.permute.xlu0 %474  ;;  %v481_v9 = vpop.permute.xlu1 %480 }
 0x188   : > { %v494_v8 = vsel %vm302_vm4, %v473_v4, %v475_v7 }
 0x189   : > { %522 = vmatprep.subr.bf16.mxu0 %v494_v8 }
 0x18a   : > { %523 = vmatpush1.bf16.msra.mxu0 %v493_v10 }
 0x18b   : > { %v479_v11 = vpop.permute.xlu0 %478  ;;  %v487_v14 = vpop.permute.xlu1 %486 }
 0x18c   : > { %v496_v12 = vsel %vm302_vm4, %v479_v11, %v481_v9  ;;  %v495_v13 = vsel %vm302_vm4, %v477_v0, %v479_v11 }
 0x18d   : > { %524 = vmatprep.subr.bf16.mxu0 %v496_v12 }
 0x18e   : > { %525 = vmatpush1.bf16.msra.mxu0 %v495_v13 }
 0x18f   : > { %v485_v15 = vpop.permute.xlu0 %484 }
 0x190   : > { %v497_v16 = vsel %vm302_vm4, %v483_v2, %v485_v15  ;;  %v498_v17 = vsel %vm302_vm4, %v485_v15, %v487_v14 }
 0x191   : > { %628 = vmatprep.subr.msk.bf16.mxu0 %vm511_vm12, %v498_v17  ;;  %v513_v18 = vsel %vm511_vm12, %v497_v16, 0 }
 0x192   : > { %527 = vmatpush1.bf16.msra.mxu0 %v513_v18 }
 0x195   : > { %629 = vmatmul.mubr.msk.bf16.vlgmr.msra.gmra.mrb[0].mxu0 %vm507_vm13, %v206_v19 }
 0x1a0   : > { %v441_v20 = vpop.permute.xlu0 %440 }
 0x268   : > { %v552_v21 = vpop.f32.mrb[0].mxu0 }
 0x269   : > { %v553_v22 = vadd.f32 %v552_v21, %v441_v20  ;;  %v554_v23 = vpop.f32.mrb[1].mxu0 }
 0x26a   : > { %v555_v24 = vadd.f32 %v554_v23, %v441_v20  ;;  %v556_v25 = vpop.f32.mrb[2].mxu0 }
 0x26b   : > { %v559_v26 = vmax.f32 %v553_v22, 0.0  ;;  %v557_v27 = vpop.f32.mrb[3].mxu0 }
 0x26c   : > { %v560_v28 = vmax.f32 %v555_v24, 0.0 }
 0x26d   : > { %561 = vst [vmem:[%s197_s20] sm:$0xff] %v559_v26 }
 0x26e   : > { %562 = vst [vmem:[%s197_s20 + $0x8] sm:$0xff] %v560_v28 }
 0x26f PF: > { %s14_s15 = sadd.s32 1, %s703_s15  }
 0x270   : > { %p11_p4 = scmp.ge.s32.totalorder %s14_s15, 4  }
 0x272   :  { %13 = sbr.rel (!%p11_p4) target bundleno = 1 (0x1), region = 67 }

</bundles_post_ra>
